<compile_context>
chip_gen: v6e
topology: v6e:2x2x1
jax: 0.10.0
libtpu: 0.0.40
codegen_flags: <defaults>
</compile_context>

<pallas_src>
import functools

import jax
import jax.numpy as jnp
from jax.experimental import pallas as pl
from jax.experimental.pallas import tpu as pltpu

D_IN, D_H, D_OUT = 900, 125, 6
D_H_PAD, D_OUT_PAD = 128, 128
TB_DEFAULT = 2048  # rows per batch tile for large batches; sweepable


def _round_up(n, m):
    return ((n + m - 1) // m) * m


def _pad2(a, rows, cols):
    out = jnp.zeros((rows, cols), a.dtype)
    return out.at[: a.shape[0], : a.shape[1]].set(a)


def _choose_tb(B, tb):
    """Pick a batch tile: multiple of 8(16), capped at tb, >=2 grid steps when useful."""
    TB = min(tb, _round_up(B, 8))
    # For moderate batches, split into at least 2 tiles so the "parallel" batch axis
    # can be sharded across both TensorCores on multi-core chips (v7x).
    if B > 32 and TB >= B:
        TB = _round_up((B + 1) // 2, 16)
    return max(TB, 8)


def mlp_kernel(x_ref, w1_ref, b1_ref, w2_ref, b2_ref, w3_ref, b3_ref, o_ref):
    # x_ref: (TB, 900) f32 ; w* bf16 (lane-padded to 128) ; b* (1, 128) f32 ;
    # o_ref: (TB, 128) bf16
    x = x_ref[...].astype(jnp.bfloat16)                                  # cast in-kernel

    h1 = jnp.dot(x, w1_ref[...], preferred_element_type=jnp.float32)     # (TB, 128) f32
    h1 = jnp.maximum(h1 + b1_ref[...], 0.0).astype(jnp.bfloat16)

    h2 = jnp.dot(h1, w2_ref[...], preferred_element_type=jnp.float32)
    h2 = jnp.maximum(h2 + b2_ref[...], 0.0).astype(jnp.bfloat16)

    h3 = jnp.dot(h2, w3_ref[...], preferred_element_type=jnp.float32)
    o_ref[...] = jnp.exp(h3 + b3_ref[...]).astype(o_ref.dtype)           # bf16 store


@functools.partial(jax.jit, static_argnames=("tb",))
def net_forward(x, padded_params, tb=TB_DEFAULT):
    """x: (B, 900) f32. padded_params: output of prepare_params. Returns (B, 6) f32."""
    w1, b1, w2, b2, w3, b3 = padded_params
    B = x.shape[0]

    TB = _choose_tb(B, tb)
    grid = (pl.cdiv(B, TB),)

    def resident(arr):
        nd = arr.ndim
        # Same block every grid step -> stays VMEM-resident, DMA'd once.
        return pl.BlockSpec(arr.shape, lambda i, _nd=nd: (0,) * _nd)

    out_padded = pl.pallas_call(
        mlp_kernel,
        out_shape=jax.ShapeDtypeStruct((B, D_OUT_PAD), jnp.bfloat16),
        grid=grid,
        in_specs=[
            pl.BlockSpec((TB, D_IN), lambda i: (i, 0)),   # x: batch-blocked, raw f32
            resident(w1),
            resident(b1),
            resident(w2),
            resident(b2),
            resident(w3),
            resident(b3),
        ],
        out_specs=pl.BlockSpec((TB, D_OUT_PAD), lambda i: (i, 0)),
        compiler_params=pltpu.CompilerParams(
            dimension_semantics=("parallel",),
            vmem_limit_bytes=32 << 20,
        ),
    )(x, w1, b1, w2, b2, w3, b3)

    # Slice off the padded output lanes; upcast to f32 for the caller.
    return out_padded[:, :D_OUT].astype(jnp.float32)


def init_params(key):
    # PyTorch nn.Linear default init: U(-1/sqrt(fan_in), 1/sqrt(fan_in)).
    # Weights stored transposed (in_features, out_features) so kernel does x @ W + b.
    ks = jax.random.split(key, 6)

    def linear(kw, kb, fan_in, fan_out):
        bound = 1.0 / jnp.sqrt(fan_in)
        w = jax.random.uniform(kw, (fan_in, fan_out), jnp.float32, -bound, bound)
        b = jax.random.uniform(kb, (1, fan_out), jnp.float32, -bound, bound)
        return w, b

    w1, b1 = linear(ks[0], ks[1], D_IN, D_H)
    w2, b2 = linear(ks[2], ks[3], D_H, D_H)
    w3, b3 = linear(ks[4], ks[5], D_H, D_OUT)
    return (w1, b1, w2, b2, w3, b3)


def prepare_params(params):
    """Pad output dims to 128 lanes; weights -> bf16, biases stay f32."""
    w1, b1, w2, b2, w3, b3 = params
    w1p = _pad2(w1, D_IN, D_H_PAD).astype(jnp.bfloat16)        # (900, 128)
    w2p = _pad2(w2, D_H_PAD, D_H_PAD).astype(jnp.bfloat16)     # (128, 128)
    w3p = _pad2(w3, D_H_PAD, D_OUT_PAD).astype(jnp.bfloat16)   # (128, 128)
    b1p = _pad2(b1, 1, D_H_PAD)
    b2p = _pad2(b2, 1, D_H_PAD)
    b3p = _pad2(b3, 1, D_OUT_PAD)
    return (w1p, b1p, w2p, b2p, w3p, b3p)


def reference_forward(x, params):
    # Full-precision reference of the PyTorch forward pass.
    w1, b1, w2, b2, w3, b3 = params
    h1 = jnp.maximum(x @ w1 + b1, 0.0)
    h2 = jnp.maximum(h1 @ w2 + b2, 0.0)
    return jnp.exp(h2 @ w3 + b3)


if __name__ == "__main__":
    key = jax.random.PRNGKey(0)
    k_x, k_p = jax.random.split(key)

    B = 8
    x = jax.random.normal(k_x, (B, D_IN), jnp.float32)
    params = init_params(k_p)
    padded_params = prepare_params(params)

    out = net_forward(x, padded_params)
    out = jax.block_until_ready(out)

    ref = reference_forward(x, params)
    assert out.shape == (B, D_OUT)
    # bf16 activations/weights/output inside the kernel -> bf16-appropriate tolerance.
    assert jnp.allclose(out, ref, rtol=5e-2, atol=5e-2), (
        f"max abs err {jnp.max(jnp.abs(out - ref))}"
    )

    print("KERNEL_OK")
</pallas_src>

<mosaic_0001>
module attributes {stable_mosaic.version = 11 : i64} {
  func.func @mlp_kernel(%arg0: i32, %arg1: memref<8x900xf32, #tpu.memory_space<vmem>>, %arg2: memref<900x128xbf16, #tpu.memory_space<vmem>>, %arg3: memref<1x128xf32, #tpu.memory_space<vmem>>, %arg4: memref<128x128xbf16, #tpu.memory_space<vmem>>, %arg5: memref<1x128xf32, #tpu.memory_space<vmem>>, %arg6: memref<128x128xbf16, #tpu.memory_space<vmem>>, %arg7: memref<1x128xf32, #tpu.memory_space<vmem>>, %arg8: memref<8x128xbf16, #tpu.memory_space<vmem>>) attributes {dimension_semantics = [#tpu.dimension_semantics<parallel>], iteration_bounds = array<i64: 1>, scalar_prefetch = 0 : i64, scratch_operands = 0 : i64, tpu.core_type = #tpu.core_type<tc>, window_params = [{transform_indices = @transform_0, window_bounds = array<i64: 8, 900>}, {pipeline_mode = #tpu.pipeline_mode<synchronous>, transform_indices = @transform_1, window_bounds = array<i64: 900, 128>}, {pipeline_mode = #tpu.pipeline_mode<synchronous>, transform_indices = @transform_2, window_bounds = array<i64: 1, 128>}, {pipeline_mode = #tpu.pipeline_mode<synchronous>, transform_indices = @transform_3, window_bounds = array<i64: 128, 128>}, {pipeline_mode = #tpu.pipeline_mode<synchronous>, transform_indices = @transform_4, window_bounds = array<i64: 1, 128>}, {pipeline_mode = #tpu.pipeline_mode<synchronous>, transform_indices = @transform_5, window_bounds = array<i64: 128, 128>}, {pipeline_mode = #tpu.pipeline_mode<synchronous>, transform_indices = @transform_6, window_bounds = array<i64: 1, 128>}, {transform_indices = @transform_7, window_bounds = array<i64: 8, 128>}]} {
    %c0 = arith.constant 0 : index
    %c0_0 = arith.constant 0 : index
    %0 = vector.load %arg1[%c0, %c0_0] : memref<8x900xf32, #tpu.memory_space<vmem>>, vector<8x900xf32>
    %1 = arith.truncf %0 : vector<8x900xf32> to vector<8x900xbf16>
    %c0_1 = arith.constant 0 : index
    %c0_2 = arith.constant 0 : index
    %2 = vector.load %arg2[%c0_1, %c0_2] : memref<900x128xbf16, #tpu.memory_space<vmem>>, vector<900x128xbf16>
    %cst = arith.constant dense<0.000000e+00> : vector<8x128xf32>
    %3 = tpu.matmul %1, %2, %cst {dimension_numbers = #tpu.dot_dimension_numbers<[1], [0], [0], [1], [0, 0, 1, 1], [], []>} : vector<8x900xbf16>, vector<900x128xbf16>, vector<8x128xf32> -> vector<8x128xf32>
    %c0_3 = arith.constant 0 : index
    %c0_4 = arith.constant 0 : index
    %4 = vector.load %arg3[%c0_3, %c0_4] : memref<1x128xf32, #tpu.memory_space<vmem>>, vector<1x128xf32>
    %5 = vector.broadcast %4 : vector<1x128xf32> to vector<8x128xf32>
    %6 = arith.addf %3, %5 : vector<8x128xf32>
    %cst_5 = arith.constant 0.000000e+00 : f32
    %7 = vector.broadcast %cst_5 : f32 to vector<8x128xf32>
    %8 = arith.maximumf %6, %7 : vector<8x128xf32>
    %9 = arith.truncf %8 : vector<8x128xf32> to vector<8x128xbf16>
    %c0_6 = arith.constant 0 : index
    %c0_7 = arith.constant 0 : index
    %10 = vector.load %arg4[%c0_6, %c0_7] : memref<128x128xbf16, #tpu.memory_space<vmem>>, vector<128x128xbf16>
    %cst_8 = arith.constant dense<0.000000e+00> : vector<8x128xf32>
    %11 = tpu.matmul %9, %10, %cst_8 {dimension_numbers = #tpu.dot_dimension_numbers<[1], [0], [0], [1], [0, 0, 1, 1], [], []>} : vector<8x128xbf16>, vector<128x128xbf16>, vector<8x128xf32> -> vector<8x128xf32>
    %c0_9 = arith.constant 0 : index
    %c0_10 = arith.constant 0 : index
    %12 = vector.load %arg5[%c0_9, %c0_10] : memref<1x128xf32, #tpu.memory_space<vmem>>, vector<1x128xf32>
    %13 = vector.broadcast %12 : vector<1x128xf32> to vector<8x128xf32>
    %14 = arith.addf %11, %13 : vector<8x128xf32>
    %cst_11 = arith.constant 0.000000e+00 : f32
    %15 = vector.broadcast %cst_11 : f32 to vector<8x128xf32>
    %16 = arith.maximumf %14, %15 : vector<8x128xf32>
    %17 = arith.truncf %16 : vector<8x128xf32> to vector<8x128xbf16>
    %c0_12 = arith.constant 0 : index
    %c0_13 = arith.constant 0 : index
    %18 = vector.load %arg6[%c0_12, %c0_13] : memref<128x128xbf16, #tpu.memory_space<vmem>>, vector<128x128xbf16>
    %cst_14 = arith.constant dense<0.000000e+00> : vector<8x128xf32>
    %19 = tpu.matmul %17, %18, %cst_14 {dimension_numbers = #tpu.dot_dimension_numbers<[1], [0], [0], [1], [0, 0, 1, 1], [], []>} : vector<8x128xbf16>, vector<128x128xbf16>, vector<8x128xf32> -> vector<8x128xf32>
    %c0_15 = arith.constant 0 : index
    %c0_16 = arith.constant 0 : index
    %20 = vector.load %arg7[%c0_15, %c0_16] : memref<1x128xf32, #tpu.memory_space<vmem>>, vector<1x128xf32>
    %21 = vector.broadcast %20 : vector<1x128xf32> to vector<8x128xf32>
    %22 = arith.addf %19, %21 : vector<8x128xf32>
    %23 = math.exp %22 : vector<8x128xf32>
    %24 = arith.truncf %23 : vector<8x128xf32> to vector<8x128xbf16>
    %c0_17 = arith.constant 0 : index
    %c0_18 = arith.constant 0 : index
    %25 = vector.load %arg8[%c0_17, %c0_18] : memref<8x128xbf16, #tpu.memory_space<vmem>>, vector<8x128xbf16>
    tpu.vector_store %arg8[%c0_17, %c0_18], %24 {strides = array<i32>} : memref<8x128xbf16, #tpu.memory_space<vmem>>, vector<8x128xbf16>,
    return
  }
  func.func @transform_0(%arg0: i32) -> (i32, i32) {
    %c0_i32 = arith.constant 0 : i32
    %c0_i32_0 = arith.constant 0 : i32
    return %arg0, %c0_i32 : i32, i32
  }
  func.func @transform_1(%arg0: i32) -> (i32, i32) {
    %c0_i32 = arith.constant 0 : i32
    %c0_i32_0 = arith.constant 0 : i32
    %c0_i32_1 = arith.constant 0 : i32
    return %c0_i32, %c0_i32_0 : i32, i32
  }
  func.func @transform_2(%arg0: i32) -> (i32, i32) {
    %c0_i32 = arith.constant 0 : i32
    %c0_i32_0 = arith.constant 0 : i32
    %c0_i32_1 = arith.constant 0 : i32
    return %c0_i32, %c0_i32_0 : i32, i32
  }
  func.func @transform_3(%arg0: i32) -> (i32, i32) {
    %c0_i32 = arith.constant 0 : i32
    %c0_i32_0 = arith.constant 0 : i32
    %c0_i32_1 = arith.constant 0 : i32
    return %c0_i32, %c0_i32_0 : i32, i32
  }
  func.func @transform_4(%arg0: i32) -> (i32, i32) {
    %c0_i32 = arith.constant 0 : i32
    %c0_i32_0 = arith.constant 0 : i32
    %c0_i32_1 = arith.constant 0 : i32
    return %c0_i32, %c0_i32_0 : i32, i32
  }
  func.func @transform_5(%arg0: i32) -> (i32, i32) {
    %c0_i32 = arith.constant 0 : i32
    %c0_i32_0 = arith.constant 0 : i32
    %c0_i32_1 = arith.constant 0 : i32
    return %c0_i32, %c0_i32_0 : i32, i32
  }
  func.func @transform_6(%arg0: i32) -> (i32, i32) {
    %c0_i32 = arith.constant 0 : i32
    %c0_i32_0 = arith.constant 0 : i32
    %c0_i32_1 = arith.constant 0 : i32
    return %c0_i32, %c0_i32_0 : i32, i32
  }
  func.func @transform_7(%arg0: i32) -> (i32, i32) {
    %c0_i32 = arith.constant 0 : i32
    %c0_i32_0 = arith.constant 0 : i32
    return %arg0, %c0_i32 : i32, i32
  }
}

</mosaic_0001>

<bundles_post_ra>
// kernel: net_forward.1
= control target key start
LH: loop header
LB: loop body
LE: loop exit
PB: predicated region body
PF: predicated region fallthrough
CT: control target
= control target key end

     0   :  { %12 = vsyncpa [#allocation3], 0  ;;  %s1440_s0 = inlined_call_operand.hbm [shape: f32[8,900], index: 0, kind: input, shape index: {}]   ;;  %s1441_s1 = inlined_call_operand.hbm [shape: bf16[900,128], index: 1, kind: input, shape index: {}]   ;;  %s1442_s2 = inlined_call_operand.vmem [shape: f32[1,128], index: 2, kind: input, shape index: {}]   ;;  %s1443_s3 = inlined_call_operand.hbm [shape: bf16[128,128], index: 3, kind: input, shape index: {}]   ;;  %s1444_s4 = inlined_call_operand.vmem [shape: f32[1,128], index: 4, kind: input, shape index: {}]   ;;  %s1445_s5 = inlined_call_operand.hbm [shape: bf16[128,128], index: 5, kind: input, shape index: {}]   ;;  %s1446_s6 = inlined_call_operand.vmem [shape: f32[1,128], index: 6, kind: input, shape index: {}]   ;;  %s1447_s7 = inlined_call_operand.vmem [shape: bf16[8,128], index: 7, kind: output, shape index: {}]  }
   0x1   :  { %13 = vsyncpa [#allocation5], 0 }
   0x2   :  { %14 = vsyncpa [#allocation8], 0  ;;  %s1331_s24 = smov [#allocation4]  }
   0x3   :  { %s30_s25 = sshll.u32 %s1331_s24, 4  ;;  %s31_s25 = int_to_ptr.vmem [resolvable:$true] %s30_s25 }
   0x4   :  { %s1253_s26 = scalar_lea.vmem %s31_s25, 7232  ;;  %p1258_p1 = scmp.lt.s32.totalorder %s31_s25, %s31_s25 }
   0x5   :  { %p1254_p0 = scmp.ne.s32.totalorder %s31_s25, %s1253_s26  ;;  %p1259_p2 = scmp.lt.s32.totalorder %s1253_s26, %s1253_s26 }
   0x7   :  { %p1260_p3 = por %p1259_p2, %p1258_p1 }
   0x9   :  { %p1261_p4 = pnand %p1260_p3, %p1254_p0 }
   0xb   :  { %1264 = shalt.err (!%p1261_p4)
}
   0xc   :  { %s1332_s27 = smov 64   ;;  %s1333_s28 = smov 4  }
   0xd   :  { %36 = dma.hbm_to_vmem [thread:$0]  %s1441_s1, 7232, %s31_s25, [#allocation5], %s1332_s27, %s1332_s27, %s1333_s28  }
   0xe   :  { %s1334_s8 = smov [#allocation2]   ;;  %s1335_s10 = smov [#allocation6]  }
   0xf   :  { %s21_s9 = sshll.u32 %s1334_s8, 4  ;;  %s44_s11 = sshll.u32 %s1335_s10, 4  ;;  %s22_s9 = int_to_ptr.vmem [resolvable:$true] %s21_s9  ;;  %s45_s11 = int_to_ptr.vmem [resolvable:$true] %s44_s11 }
  0x10   :  { %s1273_s12 = scalar_lea.vmem %s22_s9, 1024  ;;  %p1278_p6 = scmp.lt.s32.totalorder %s22_s9, %s22_s9 }
  0x11   :  { %p1274_p5 = scmp.ne.s32.totalorder %s22_s9, %s1273_s12  ;;  %p1279_p7 = scmp.lt.s32.totalorder %s1273_s12, %s1273_s12 }
  0x13   :  { %p1280_p8 = por %p1279_p7, %p1278_p6 }
  0x15   :  { %p1281_p9 = pnand %p1280_p8, %p1274_p5 }
  0x17   :  { %1284 = shalt.err (!%p1281_p9)
}
  0x18   :  { %24 = dma.hbm_to_vmem [thread:$0]  %s1440_s0, 1024, %s22_s9, [#allocation3]  }
  0x19   :  { %s1293_s15 = scalar_lea.vmem %s45_s11, 1024  ;;  %p1298_p11 = scmp.lt.s32.totalorder %s45_s11, %s45_s11 }
  0x1a   :  { %p1294_p10 = scmp.ne.s32.totalorder %s45_s11, %s1293_s15  ;;  %p1299_p12 = scmp.lt.s32.totalorder %s1293_s15, %s1293_s15 }
  0x1c   :  { %p1300_p13 = por %p1299_p12, %p1298_p11 }
  0x1e   :  { %p1301_p0 = pnand %p1300_p13, %p1294_p10 }
  0x20   :  { %1304 = shalt.err (!%p1301_p0)
}
  0x21   :  { %50 = dma.hbm_to_vmem [thread:$0]  %s1443_s3, 1024, %s45_s11, [#allocation5], %s1332_s27, %s1332_s27, %s1333_s28  }
  0x22   :  { %s1336_s17 = smov [#allocation7]  }
  0x23   :  { %s58_s18 = sshll.u32 %s1336_s17, 4  ;;  %s59_s18 = int_to_ptr.vmem [resolvable:$true] %s58_s18 }
  0x24   :  { %s1313_s19 = scalar_lea.vmem %s59_s18, 1024  ;;  %p1318_p2 = scmp.lt.s32.totalorder %s59_s18, %s59_s18 }
  0x25   :  { %p1314_p1 = scmp.ne.s32.totalorder %s59_s18, %s1313_s19  ;;  %p1319_p3 = scmp.lt.s32.totalorder %s1313_s19, %s1313_s19 }
  0x27   :  { %p1320_p4 = por %p1319_p3, %p1318_p2 }
  0x29   :  { %p1321_p5 = pnand %p1320_p4, %p1314_p1 }
  0x2b   :  { %1324 = shalt.err (!%p1321_p5)
}
  0x2c   :  { %64 = dma.hbm_to_vmem [thread:$0]  %s1445_s5, 1024, %s59_s18, [#allocation8], %s1332_s27, %s1332_s27, %s1333_s28  }
  0x2d   :  { %1325 = dma.done.wait [#allocation3], 1024  }
  0x2e   :  { %1326 = vsyncadd [#allocation3], 4294966272 }
  0x2f   :  { %1327 = dma.done.wait [#allocation5], 8256  }
  0x30   :  { %1328 = vsyncadd [#allocation5], 4294959040 }
  0x31   :  { %1329 = dma.done.wait [#allocation8], 1024  }
  0x32   :  { %1330 = vsyncadd [#allocation8], 4294966272  ;;  %v1170_v0 = vld [vmem:[#allocation4 + $0x78] sm:$0xff]   ;;  %v1174_v4 = vld [vmem:[#allocation4 + $0x70] sm:$0xff]   ;;  %v1337_v41 = vmov 0   ;;  %vm559_vm0 = vcmask 1041408  }
  0x33   :  { %v1171_v1 = vld [vmem:[#allocation4 + $0xf8] sm:$0xff]   ;;  %1037 = vmatprep.subr.bf16.mxu0 %v1170_v0  ;;  %v1175_v5 = vld [vmem:[#allocation4 + $0xf0] sm:$0xff]   ;;  %v1178_v8 = vld [vmem:[#allocation4 + $0x68] sm:$0xff]   ;;  %vm555_vm1 = vcmask 31744   ;;  %vm1339_vm2 = vmmov 0  }
  0x34   :  { %v1172_v2 = vld [vmem:[#allocation4 + $0x38] sm:$0xff]   ;;  %1059 = vmatprep.subr.bf16.mxu1 %v1171_v1  ;;  %v1176_v6 = vld [vmem:[#allocation4 + $0x30] sm:$0xff]   ;;  %v1179_v9 = vld [vmem:[#allocation4 + $0xe8] sm:$0xff]  }
  0x35   :  { %v1173_v3 = vld [vmem:[#allocation4 + $0xb8] sm:$0xff]   ;;  %1038 = vmatpush3.bf16.msra.mxu0 %v1172_v2  ;;  %v1177_v7 = vld [vmem:[#allocation4 + $0xb0] sm:$0xff]   ;;  %v1180_v10 = vld [vmem:[#allocation4 + $0x28] sm:$0xff]  }
  0x36   :  { %1060 = vmatpush3.bf16.msra.mxu1 %v1173_v3  ;;  %1039 = vmatprep.subr.bf16.mxu0 %v1174_v4  ;;  %v1181_v11 = vld [vmem:[#allocation4 + $0xa8] sm:$0xff]   ;;  %v1182_v12 = vld [vmem:[#allocation4 + $0x60] sm:$0xff]   ;;  %v1186_v16 = vld [vmem:[#allocation4 + $0x58] sm:$0xff]  }
  0x37   :  { %1061 = vmatprep.subr.bf16.mxu1 %v1175_v5  ;;  %v1183_v13 = vld [vmem:[#allocation4 + $0xe0] sm:$0xff]   ;;  %v1187_v17 = vld [vmem:[#allocation4 + $0xd8] sm:$0xff]   ;;  %v1190_v20 = vld [vmem:[#allocation4 + $0x50] sm:$0xff]  }
  0x38   :  { %v1184_v14 = vld [vmem:[#allocation4 + $0x20] sm:$0xff]   ;;  %v1188_v18 = vld [vmem:[#allocation4 + $0x18] sm:$0xff]   ;;  %v1191_v21 = vld [vmem:[#allocation4 + $0xd0] sm:$0xff]  }
  0x39   :  { %1040 = vmatpush3.bf16.msra.mxu0 %v1176_v6  ;;  %v1185_v15 = vld [vmem:[#allocation4 + $0xa0] sm:$0xff]   ;;  %v1189_v19 = vld [vmem:[#allocation4 + $0x98] sm:$0xff]   ;;  %v1192_v22 = vld [vmem:[#allocation4 + $0x10] sm:$0xff]  }
  0x3a   :  { %1062 = vmatpush3.bf16.msra.mxu1 %v1177_v7  ;;  %1041 = vmatprep.subr.bf16.mxu0 %v1178_v8  ;;  %v1193_v23 = vld [vmem:[#allocation4 + $0x90] sm:$0xff]   ;;  %v1194_v24 = vld [vmem:[#allocation4 + $0x48] sm:$0xff]   ;;  %v1198_v28 = vld [vmem:[#allocation4 + $0x40] sm:$0xff]  }
  0x3b   :  { %1063 = vmatprep.subr.bf16.mxu1 %v1179_v9  ;;  %v1195_v25 = vld [vmem:[#allocation4 + $0xc8] sm:$0xff]   ;;  %v1199_v29 = vld [vmem:[#allocation4 + $0xc0] sm:$0xff]   ;;  %v83_v33 = vld [vmem:[#allocation2 + $0x18] sm:$0xff] }
  0x3c   :  { %v1196_v26 = vld [vmem:[#allocation4 + $0x8] sm:$0xff]   ;;  %v1200_v30 = vld [vmem:[#allocation4] sm:$0xff]   ;;  %v91_v36 = vpack.c.bf16 %v83_v33, %v83_v33  ;;  %v82_v38 = vld [vmem:[#allocation2 + $0x10] sm:$0xff] }
  0x3d   :  { %1042 = vmatpush3.bf16.msra.mxu0 %v1180_v10  ;;  %v1197_v27 = vld [vmem:[#allocation4 + $0x88] sm:$0xff]   ;;  %v1201_v31 = vld [vmem:[#allocation4 + $0x80] sm:$0xff]   ;;  %v90_v39 = vpack.c.bf16 %v82_v38, %v82_v38  ;;  %v1202_v40 = vld [vmem:[#allocation4 + $0x178] sm:$0xff]  }
  0x3e   :  { %1064 = vmatpush3.bf16.msra.mxu1 %v1181_v11  ;;  %1043 = vmatprep.subr.bf16.mxu0 %v1182_v12  ;;  %v81_v32 = vld [vmem:[#allocation2 + $0x8] sm:$0xff]  ;;  %v80_v34 = vld [vmem:[#allocation2] sm:$0xff]  ;;  %v1203_v42 = vld [vmem:[#allocation4 + $0x138] sm:$0xff]   ;;  %v1338_v12 = vmov 0.0  }
  0x3f   :  { %1065 = vmatprep.subr.bf16.mxu1 %v1183_v13  ;;  %v89_v35 = vpack.c.bf16 %v81_v32, %v81_v32  ;;  %v88_v37 = vpack.c.bf16 %v80_v34, %v80_v34  ;;  %635 = vmatprep.mubr.bf16.mxu1 %v91_v36  ;;  %v1204_v43 = vld [vmem:[#allocation4 + $0x1b8] sm:$0xff]   ;;  %v1205_v44 = vld [vmem:[#allocation4 + $0x170] sm:$0xff]   ;;  %v1208_v47 = vld [vmem:[#allocation4 + $0x168] sm:$0xff]  }
  0x40   :  { %v1206_v45 = vld [vmem:[#allocation4 + $0x130] sm:$0xff]   ;;  %v1209_v48 = vld [vmem:[#allocation4 + $0x128] sm:$0xff]   ;;  %v1211_v50 = vld [vmem:[#allocation4 + $0x160] sm:$0xff]  }
  0x41   :  { %1044 = vmatpush3.bf16.msra.mxu0 %v1184_v14  ;;  %595 = vmatprep.mubr.bf16.mxu0 %v89_v35  ;;  %v1207_v46 = vld [vmem:[#allocation4 + $0x1b0] sm:$0xff]   ;;  %v1210_v49 = vld [vmem:[#allocation4 + $0x1a8] sm:$0xff]   ;;  %v1212_v51 = vld [vmem:[#allocation4 + $0x120] sm:$0xff]  }
  0x42   :  { %1066 = vmatpush3.bf16.msra.mxu1 %v1185_v15  ;;  %1045 = vmatprep.subr.bf16.mxu0 %v1186_v16  ;;  %v1213_v52 = vld [vmem:[#allocation4 + $0x1a0] sm:$0xff]   ;;  %v1214_v53 = vld [vmem:[#allocation4 + $0x158] sm:$0xff]   ;;  %v1217_v56 = vld [vmem:[#allocation4 + $0x150] sm:$0xff]  }
  0x43   :  { %1067 = vmatprep.subr.bf16.mxu1 %v1187_v17  ;;  %v1215_v54 = vld [vmem:[#allocation4 + $0x118] sm:$0xff]   ;;  %v1218_v57 = vld [vmem:[#allocation4 + $0x110] sm:$0xff]   ;;  %v1220_v59 = vld [vmem:[#allocation4 + $0x148] sm:$0xff]  }
  0x44   :  { %v1216_v55 = vld [vmem:[#allocation4 + $0x198] sm:$0xff]   ;;  %v1219_v58 = vld [vmem:[#allocation4 + $0x190] sm:$0xff]   ;;  %v1221_v60 = vld [vmem:[#allocation4 + $0x108] sm:$0xff]  }
  0x45   :  { %1046 = vmatpush3.bf16.msra.mxu0 %v1188_v18  ;;  %v1222_v61 = vld [vmem:[#allocation4 + $0x188] sm:$0xff]   ;;  %v1226_v0 = vld [vmem:[#allocation4 + $0x1c0] ss:$0 sps:$4 sm:$0x33]   ;;  %v87_v1 = vld [vmem:[#allocation2 + $0x38] sm:$0xff] }
  0x46   :  { %1068 = vmatpush3.bf16.msra.mxu1 %v1189_v19  ;;  %1047 = vmatprep.subr.bf16.mxu0 %v1190_v20  ;;  %v85_v62 = vld [vmem:[#allocation2 + $0x28] sm:$0xff]  ;;  %v1223_v2 = vld [vmem:[#allocation4 + $0x140] sm:$0xff]   ;;  %v95_v3 = vpack.c.bf16 %v87_v1, %v87_v1  ;;  %v561_v7 = vsel %vm559_vm0, %v1226_v0, 0  ;;  %v86_v8 = vld [vmem:[#allocation2 + $0x30] sm:$0xff] }
  0x47   :  { %1069 = vmatprep.subr.bf16.mxu1 %v1191_v21  ;;  %v93_v63 = vpack.c.bf16 %v85_v62, %v85_v62  ;;  %v1224_v4 = vld [vmem:[#allocation4 + $0x100] sm:$0xff]   ;;  %v94_v10 = vpack.c.bf16 %v86_v8, %v86_v8  ;;  %v1228_v13 = vld [vmem:[#allocation6 + $0x30] sm:$0xff]   ;;  %v1229_v14 = vld [vmem:[#allocation6 + $0x28] sm:$0xff]  }
  0x48   :  { %v1225_v5 = vld [vmem:[#allocation4 + $0x180] sm:$0xff]   ;;  %v1232_v17 = vld [vmem:[#allocation6 + $0x10] sm:$0xff]   ;;  %v1233_v18 = vld [vmem:[#allocation6 + $0x8] sm:$0xff]  }
  0x49   :  { %1048 = vmatpush3.bf16.msra.mxu0 %v1192_v22  ;;  %v84_v6 = vld [vmem:[#allocation2 + $0x20] sm:$0xff]  ;;  %v1236_v21 = vld [vmem:[#allocation7 + $0x30] sm:$0xff]   ;;  %v1237_v22 = vld [vmem:[#allocation7 + $0x28] sm:$0xff]  }
  0x4a   :  { %1070 = vmatpush3.bf16.msra.mxu1 %v1193_v23  ;;  %1049 = vmatprep.subr.bf16.mxu0 %v1194_v24  ;;  %v92_v9 = vpack.c.bf16 %v84_v6, %v84_v6  ;;  %v1227_v11 = vld [vmem:[#allocation6 + $0x38] sm:$0xff]   ;;  %v1230_v15 = vld [vmem:[#allocation6 + $0x20] sm:$0xff]  }
  0x4b   :  { %1071 = vmatprep.subr.bf16.mxu1 %v1195_v25  ;;  %v1231_v16 = vld [vmem:[#allocation6 + $0x18] sm:$0xff]   ;;  %v1234_v19 = vld [vmem:[#allocation6] sm:$0xff]   ;;  %v1240_v25 = vld [vmem:[#allocation7 + $0x10] sm:$0xff]  }
  0x4c   :  { %v1235_v20 = vld [vmem:[#allocation7 + $0x38] sm:$0xff]   ;;  %v1238_v23 = vld [vmem:[#allocation7 + $0x20] sm:$0xff]  }
  0x4d   :  { %1050 = vmatpush3.bf16.msra.mxu0 %v1196_v26  ;;  %v1239_v24 = vld [vmem:[#allocation7 + $0x18] sm:$0xff]  }
  0x4e   :  { %1072 = vmatpush3.bf16.msra.mxu1 %v1197_v27  ;;  %1051 = vmatprep.subr.bf16.mxu0 %v1198_v28  ;;  %v960_v35 = vld [vmem:[%s1442_s2] ss:$0 sm:$0xff] }
  0x4f   :  { %1073 = vmatprep.subr.bf16.mxu1 %v1199_v29  ;;  %v1028_v62 = vld [vmem:[%s1446_s6] ss:$0 sm:$0xff] }
  0x51   :  { %1052 = vmatpush3.bf16.msra.mxu0 %v1200_v30 }
  0x52   :  { %1074 = vmatpush3.bf16.msra.mxu1 %v1201_v31  ;;  %1081 = vmatprep.subr.bf16.mxu0 %v1202_v40 }
  0x53   :  { %683 = vmatprep.subr.bf16.mxu1 %v1337_v41 }
  0x54   :  { %596 = vmatmul.mubr.bf16.vlgmr.msra.gmra.mxu0 %v88_v37 }
  0x55   :  { %636 = vmatmul.mubr.bf16.vlgmr.msra.gmra.mxu1 %v90_v39  ;;  %1082 = vmatpush3.bf16.msra.mxu0 %v1203_v42 }
  0x56   :  { %684 = vmatpush1.bf16.msra.mxu1 %v1204_v43  ;;  %1083 = vmatprep.subr.bf16.mxu0 %v1205_v44 }
  0x57   :  { %685 = vmatprep.subr.bf16.mxu1 %v1337_v41  ;;  %675 = vmatprep.mubr.bf16.mxu0 %v93_v63 }
  0x58   :  { %1018 = vmatprep.mubr.msk.bf16.mxu1 %vm555_vm1, %v95_v3 }
  0x59   :  { %1084 = vmatpush3.bf16.msra.mxu0 %v1206_v45 }
  0x5a   :  { %686 = vmatpush1.bf16.msra.mxu1 %v1207_v46  ;;  %1085 = vmatprep.subr.bf16.mxu0 %v1208_v47 }
  0x5b   :  { %687 = vmatprep.subr.bf16.mxu1 %v1337_v41 }
  0x5d   :  { %1086 = vmatpush3.bf16.msra.mxu0 %v1209_v48 }
  0x5e   :  { %688 = vmatpush1.bf16.msra.mxu1 %v1210_v49  ;;  %1087 = vmatprep.subr.bf16.mxu0 %v1211_v50 }
  0x5f   :  { %689 = vmatprep.subr.bf16.mxu1 %v1337_v41 }
  0x61   :  { %1088 = vmatpush3.bf16.msra.mxu0 %v1212_v51 }
  0x62   :  { %690 = vmatpush1.bf16.msra.mxu1 %v1213_v52  ;;  %1089 = vmatprep.subr.bf16.mxu0 %v1214_v53  ;;  %v1241_v52 = vld [vmem:[#allocation7 + $0x8] sm:$0xff]   ;;  %v1242_v53 = vld [vmem:[#allocation7] sm:$0xff]  }
  0x63   :  { %691 = vmatprep.subr.bf16.mxu1 %v1337_v41 }
  0x65   :  { %1090 = vmatpush3.bf16.msra.mxu0 %v1215_v54  ;;  %v1019_v54 = vld [vmem:[%s1444_s4] ss:$0 sm:$0xff] }
  0x66   :  { %692 = vmatpush1.bf16.msra.mxu1 %v1216_v55  ;;  %1091 = vmatprep.subr.bf16.mxu0 %v1217_v56 }
  0x67   :  { %693 = vmatprep.subr.bf16.mxu1 %v1337_v41 }
  0x69   :  { %1092 = vmatpush3.bf16.msra.mxu0 %v1218_v57 }
  0x6a   :  { %694 = vmatpush1.bf16.msra.mxu1 %v1219_v58  ;;  %1093 = vmatprep.subr.bf16.mxu0 %v1220_v59 }
  0x6b   :  { %695 = vmatprep.subr.bf16.mxu1 %v1337_v41 }
  0x6d   :  { %1094 = vmatpush3.bf16.msra.mxu0 %v1221_v60 }
  0x6e   :  { %696 = vmatpush1.bf16.msra.mxu1 %v1222_v61  ;;  %1095 = vmatprep.subr.bf16.mxu0 %v1223_v2 }
  0x6f   :  { %697 = vmatprep.subr.bf16.mxu1 %v1337_v41 }
  0x71   :  { %1096 = vmatpush3.bf16.msra.mxu0 %v1224_v4 }
  0x72   :  { %698 = vmatpush1.bf16.msra.mxu1 %v1225_v5  ;;  %1121 = vmatprep.subr.bf16.mxu0 %v1338_v12 }
  0x73   :  { %713 = vmatprep.subr.bf16.mxu1 %v1337_v41 }
  0x74   :  { %676 = vmatmul.mubr.bf16.vlgmr.msra.gmra.mxu0 %v92_v9 }
  0x75   :  { %1122 = vmatpush3.bf16.msra.mxu0 %v1227_v11  ;;  %1137 = vmatprep.mubr.msk.bf16.mxu0 %vm1339_vm2, %v1338_v12 }
  0x76   :  { %714 = vmatpush2.bf16.msra.mxu1 %v561_v7  ;;  %1123 = vmatprep.subr.bf16.mxu0 %v1338_v12 }
  0x77   :  { %1141 = vmatprep.subr.bf16.mxu1 %v1338_v12 }
  0x79   :  { %716 = vmatmul.mubr.bf16.vlgmr.msra.gmra.mxu1 %v94_v10  ;;  %1124 = vmatpush3.bf16.msra.mxu0 %v1228_v13 }
  0x7a   :  { %1125 = vmatprep.subr.bf16.mxu0 %v1338_v12  ;;  %1157 = vmatprep.mubr.msk.bf16.mxu1 %vm1339_vm2, %v1338_v12 }
  0x7b   :  { %1142 = vmatpush3.bf16.msra.mxu1 %v1235_v20 }
  0x7c   :  { %1143 = vmatprep.subr.bf16.mxu1 %v1338_v12 }
  0x7d   :  { %1126 = vmatpush3.bf16.msra.mxu0 %v1229_v14 }
  0x7e   :  { %1127 = vmatprep.subr.bf16.mxu0 %v1338_v12 }
  0x7f   :  { %1144 = vmatpush3.bf16.msra.mxu1 %v1236_v21 }
  0x80   :  { %1145 = vmatprep.subr.bf16.mxu1 %v1338_v12 }
  0x81   :  { %1128 = vmatpush3.bf16.msra.mxu0 %v1230_v15 }
  0x82   :  { %1129 = vmatprep.subr.bf16.mxu0 %v1338_v12 }
  0x83   :  { %1146 = vmatpush3.bf16.msra.mxu1 %v1237_v22 }
  0x84   :  { %1147 = vmatprep.subr.bf16.mxu1 %v1338_v12 }
  0x85   :  { %1130 = vmatpush3.bf16.msra.mxu0 %v1231_v16 }
  0x86   :  { %1131 = vmatprep.subr.bf16.mxu0 %v1338_v12 }
  0x87   :  { %1148 = vmatpush3.bf16.msra.mxu1 %v1238_v23 }
  0x88   :  { %1149 = vmatprep.subr.bf16.mxu1 %v1338_v12 }
  0x89   :  { %1132 = vmatpush3.bf16.msra.mxu0 %v1232_v17 }
  0x8a   :  { %1133 = vmatprep.subr.bf16.mxu0 %v1338_v12 }
  0x8b   :  { %1150 = vmatpush3.bf16.msra.mxu1 %v1239_v24 }
  0x8c   :  { %1151 = vmatprep.subr.bf16.mxu1 %v1338_v12 }
  0x8d   :  { %1134 = vmatpush3.bf16.msra.mxu0 %v1233_v18 }
  0x8e   :  { %1135 = vmatprep.subr.bf16.mxu0 %v1338_v12 }
  0x8f   :  { %1152 = vmatpush3.bf16.msra.mxu1 %v1240_v25 }
  0x90   :  { %1153 = vmatprep.subr.bf16.mxu1 %v1338_v12 }
  0x91   :  { %1136 = vmatpush3.bf16.msra.mxu0 %v1234_v19 }
  0x93   :  { %1154 = vmatpush3.bf16.msra.mxu1 %v1241_v52 }
  0x94   :  { %1155 = vmatprep.subr.bf16.mxu1 %v1338_v12 }
  0x97   :  { %1156 = vmatpush3.bf16.msra.mxu1 %v1242_v53 }
 0x114   :  { %v1053_v26 = vpop.f32.mrf.mxu0 }
 0x115   :  { %v1075_v27 = vpop.f32.mrf.mxu1 }
 0x116   :  { %v1054_v28 = vpop.f32.mrf.mxu0 }
 0x117   :  { %v1076_v29 = vpop.f32.mrf.mxu1  ;;  %v1055_v34 = vadd.f32 %v1054_v28, %v1053_v26 }
 0x118   :  { %v1056_v30 = vpop.f32.mrf.mxu0  ;;  %v1077_v37 = vadd.f32 %v1076_v29, %v1075_v27 }
 0x119   :  { %v1078_v31 = vpop.f32.mrf.mxu1  ;;  %v598_v36 = vadd.f32 %v1055_v34, %v960_v35 }
 0x11a   :  { %v1057_v32 = vpop.f32.mrf.mxu0 }
 0x11b   :  { %v1079_v33 = vpop.f32.mrf.mxu1  ;;  %v638_v40 = vadd.f32 %v1077_v37, %v598_v36 }
 0x134   :  { %v1097_v38 = vpop.f32.mrf.mxu0 }
 0x136   :  { %v1098_v39 = vpop.f32.mrf.mxu0 }
 0x137   :  { %v1099_v41 = vadd.f32 %v1098_v39, %v1097_v38 }
 0x138   :  { %v1100_v42 = vpop.f32.mrf.mxu0 }
 0x139   :  { %v717_v43 = vpop.f32.mrf.mxu1  ;;  %v678_v44 = vadd.f32 %v1099_v41, %v638_v40 }
 0x13a   :  { %v1101_v45 = vpop.f32.mrf.mxu0 }
 0x13b   :  { %v719_v46 = vpop.f32.mrf.mxu1  ;;  %v718_v47 = vadd.f32 %v717_v43, %v678_v44 }
 0x13d   :  { %v720_v48 = vpop.f32.mrf.mxu1  ;;  %v723_v49 = vmax.f32 %v718_v47, 0.0 }
 0x13f   :  { %v721_v50 = vpop.f32.mrf.mxu1  ;;  %v724_v51 = vpack.c.bf16 %v723_v49, %v723_v49 }
 0x141   :  { %1138 = vmatmul.mubr.bf16.vlgmr.msra.gmra.mxu0 %v724_v51 }
 0x201   :  { %v830_v55 = vpop.f32.mrf.mxu0 }
 0x202   :  { %v831_v56 = vadd.f32 %v1019_v54, %v830_v55 }
 0x203   :  { %v1139_v57 = vpop.f32.mrf.mxu0 }
 0x204   :  { %v836_v58 = vmax.f32 %v831_v56, 0.0 }
 0x205   :  { %v833_v59 = vpop.f32.mrf.mxu0 }
 0x206   :  { %v837_v60 = vpack.c.bf16 %v836_v58, %v836_v58 }
 0x207   :  { %v1140_v61 = vpop.f32.mrf.mxu0 }
 0x208   :  { %1158 = vmatmul.mubr.bf16.vlgmr.msra.gmra.mxu1 %v837_v60 }
 0x2c8   :  { %v943_v63 = vpop.f32.mrf.mxu1 }
 0x2c9   :  { %v944_v0 = vadd.f32 %v1028_v62, %v943_v63 }
 0x2ca   :  { %v1159_v1 = vpop.f32.mrf.mxu1 }
 0x2cb   :  { %v949_v2 = vmul.f32 1.442695, %v944_v0 }
 0x2cc   :  { %v946_v3 = vpop.f32.mrf.mxu1 }
 0x2cd   :  { %1243 = vpow2.f32 %v949_v2 }
 0x2ce   :  { %v1160_v4 = vpop.f32.mrf.mxu1 }
 0x2da   :  { %v1244_v5 = vpop.eup %1243 }
 0x2db   :  { %v951_v6 = vpack.c.bf16 %v1244_v5, %v1244_v5 }
 0x2dd   :  { %952 = vst [vmem:[%s1447_s7] sm:$0xf] %v951_v6 }
 0x2de   :  { %957 = vsyncpa [#allocation3], 1 }
 0x2df   :  { %958 = vsyncpa [#allocation5], 1 }
 0x2e0   :  { %959 = vsyncpa [#allocation8], 1 }

</bundles_post_ra>
